<compile_context>
chip_gen: v7x
topology: tpu7x:2x2x1
jax: 0.10.0
libtpu: 0.0.40
codegen_flags: <defaults>
</compile_context>

<pallas_src>
import functools

import jax
import jax.numpy as jnp
from jax.experimental import pallas as pl
from jax.experimental.pallas import tpu as pltpu

# ----- config implied by the module -----
SEQ_LEN = 8
D_MODEL = 32
OUT_DIM = 5
IN_DIM = SEQ_LEN * D_MODEL          # 256
HID = 128                           # lane-dense padded width for hidden dims (8, 32)
OUT_PAD = 8                         # sublane-aligned padded width for the 5-wide output
BATCH = 2


def _round_up(n, m):
    return ((n + m - 1) // m) * m


def _cdiv(a, b):
    return -(-a // b)


def bp_kernel(x_ref, w1_ref, b1_ref, w2_ref, b2_ref, w3_ref, b3_ref, o_ref):
    # fc1: Linear(256 -> 8, padded to 128) + ReLU     (f32 MXU, f32 accumulate)
    h = jnp.dot(x_ref[...], w1_ref[...], preferred_element_type=jnp.float32)
    h = jnp.maximum(h + b1_ref[...], 0.0)
    # fc2: Linear(8 -> 32, padded to 128x128) + ReLU
    h = jnp.dot(h, w2_ref[...], preferred_element_type=jnp.float32)
    h = jnp.maximum(h + b2_ref[...], 0.0)
    # fc3: Linear(32 -> 5, padded to 128x8), no activation
    h = jnp.dot(h, w3_ref[...], preferred_element_type=jnp.float32)
    o_ref[...] = (h + b3_ref[...]).astype(o_ref.dtype)


def _pad2d(a, rows, cols):
    return jnp.pad(a, ((0, rows - a.shape[0]), (0, cols - a.shape[1])))


def prepare_params(w1, b1, w2, b2, w3, b3):
    """One-time padding of weights/biases (hoisted out of the per-call path)."""
    f32 = jnp.float32
    w1p = _pad2d(w1.astype(f32), IN_DIM, HID)
    b1p = _pad2d(b1.astype(f32).reshape(1, -1), 1, HID)
    w2p = _pad2d(w2.astype(f32), HID, HID)
    b2p = _pad2d(b2.astype(f32).reshape(1, -1), 1, HID)
    w3p = _pad2d(w3.astype(f32), HID, OUT_PAD)
    b3p = _pad2d(b3.astype(f32).reshape(1, -1), 1, OUT_PAD)
    return (w1p, b1p, w2p, b2p, w3p, b3p)


def _choose_tiling(B, tile_cap):
    """Pick (tile_m, padded_batch).  Targets >=4 grid steps for non-trivial batches
    (so each v7x TC pipelines >=2 steps) while bounding padded-row waste."""
    B = max(B, 1)
    n = max(1, _cdiv(B, tile_cap))
    if B >= 512:
        n = max(n, 4)
    tm = min(_round_up(_cdiv(B, n), 8), tile_cap)
    b_pad = _round_up(B, tm)
    return tm, b_pad


@functools.partial(jax.jit, static_argnames=("tile_cap",))
def bp_forward(x, params, *, tile_cap=1024):
    """x: (B, 256) f32.  params: output of prepare_params.  Returns (B, 5) f32."""
    w1p, b1p, w2p, b2p, w3p, b3p = params
    B = x.shape[0]
    tm, b_pad = _choose_tiling(B, tile_cap)
    n_tiles = b_pad // tm

    x = x.astype(jnp.float32)
    xp = x if b_pad == B else jnp.pad(x, ((0, b_pad - B), (0, 0)))  # row-pad only

    inv = lambda shape: pl.BlockSpec(shape, lambda i: (0, 0))       # grid-invariant block

    param_bytes = 4 * (IN_DIM * HID + HID * HID + HID * OUT_PAD + 2 * HID + OUT_PAD)
    cost = pl.CostEstimate(
        flops=2 * b_pad * (IN_DIM * HID + HID * HID + HID * OUT_PAD),
        transcendentals=0,
        bytes_accessed=4 * b_pad * (IN_DIM + OUT_PAD) + param_bytes,
    )

    out_padded = pl.pallas_call(
        bp_kernel,
        out_shape=jax.ShapeDtypeStruct((b_pad, OUT_PAD), jnp.float32),
        grid=(n_tiles,),
        in_specs=[
            pl.BlockSpec((tm, IN_DIM), lambda i: (i, 0)),           # x: tiled over batch
            inv((IN_DIM, HID)), inv((1, HID)),                      # w1, b1
            inv((HID, HID)), inv((1, HID)),                         # w2, b2
            inv((HID, OUT_PAD)), inv((1, OUT_PAD)),                 # w3, b3
        ],
        out_specs=pl.BlockSpec((tm, OUT_PAD), lambda i: (i, 0)),    # narrow padded output
        compiler_params=pltpu.CompilerParams(
            dimension_semantics=("parallel",)),
        cost_estimate=cost,
    )(xp, w1p, b1p, w2p, b2p, w3p, b3p)

    return out_padded[:B, :OUT_DIM]


def init_params(key):
    """Deterministic init mimicking nn.Linear default: U(-1/sqrt(fan_in), 1/sqrt(fan_in))."""
    ks = jax.random.split(key, 6)

    def linear(kw, kb, fan_in, fan_out):
        bound = 1.0 / jnp.sqrt(jnp.float32(fan_in))
        w = jax.random.uniform(kw, (fan_in, fan_out), jnp.float32, -bound, bound)
        b = jax.random.uniform(kb, (fan_out,), jnp.float32, -bound, bound)
        return w, b

    w1, b1 = linear(ks[0], ks[1], IN_DIM, SEQ_LEN)
    w2, b2 = linear(ks[2], ks[3], SEQ_LEN, D_MODEL)
    w3, b3 = linear(ks[4], ks[5], D_MODEL, OUT_DIM)
    return w1, b1, w2, b2, w3, b3


def reference(x, w1, b1, w2, b2, w3, b3):
    h = jnp.maximum(x @ w1 + b1, 0.0)
    h = jnp.maximum(h @ w2 + b2, 0.0)
    return h @ w3 + b3


if __name__ == "__main__":
    key = jax.random.PRNGKey(0)
    kx, kx2, kp = jax.random.split(key, 3)
    raw_params = init_params(kp)
    params = jax.tree_util.tree_map(
        jax.block_until_ready, prepare_params(*raw_params))   # one-time param prep

    # Small case matching the module spec (batch=2, seq_len*d_model=256 features).
    x = jax.random.normal(kx, (BATCH, IN_DIM), jnp.float32)
    out = jax.block_until_ready(bp_forward(x, params))
    ref = reference(x, *raw_params)
    assert out.shape == (BATCH, OUT_DIM), out.shape
    assert jnp.allclose(out, ref, atol=2e-2, rtol=2e-2), float(jnp.max(jnp.abs(out - ref)))

    # Larger batch exercising the tiled / pipelined grid path (4 x 256-row tiles).
    xb = jax.random.normal(kx2, (1024, IN_DIM), jnp.float32)
    outb = jax.block_until_ready(bp_forward(xb, params))
    refb = reference(xb, *raw_params)
    assert outb.shape == (1024, OUT_DIM), outb.shape
    assert jnp.allclose(outb, refb, atol=2e-2, rtol=2e-2), float(jnp.max(jnp.abs(outb - refb)))

    print("KERNEL_OK")
</pallas_src>

<mosaic_0001>
module attributes {stable_mosaic.version = 11 : i64} {
  func.func @bp_kernel(%arg0: i32, %arg1: memref<8x256xf32, #tpu.memory_space<vmem>>, %arg2: memref<256x128xf32, #tpu.memory_space<vmem>>, %arg3: memref<1x128xf32, #tpu.memory_space<vmem>>, %arg4: memref<128x128xf32, #tpu.memory_space<vmem>>, %arg5: memref<1x128xf32, #tpu.memory_space<vmem>>, %arg6: memref<128x8xf32, #tpu.memory_space<vmem>>, %arg7: memref<1x8xf32, #tpu.memory_space<vmem>>, %arg8: memref<8x8xf32, #tpu.memory_space<vmem>>) attributes {dimension_semantics = [#tpu.dimension_semantics<parallel>], iteration_bounds = array<i64: 1>, scalar_prefetch = 0 : i64, scratch_operands = 0 : i64, tpu.core_type = #tpu.core_type<tc>, window_params = [{transform_indices = @transform_0, window_bounds = array<i64: 8, 256>}, {pipeline_mode = #tpu.pipeline_mode<synchronous>, transform_indices = @transform_1, window_bounds = array<i64: 256, 128>}, {pipeline_mode = #tpu.pipeline_mode<synchronous>, transform_indices = @transform_2, window_bounds = array<i64: 1, 128>}, {pipeline_mode = #tpu.pipeline_mode<synchronous>, transform_indices = @transform_3, window_bounds = array<i64: 128, 128>}, {pipeline_mode = #tpu.pipeline_mode<synchronous>, transform_indices = @transform_4, window_bounds = array<i64: 1, 128>}, {pipeline_mode = #tpu.pipeline_mode<synchronous>, transform_indices = @transform_5, window_bounds = array<i64: 128, 8>}, {pipeline_mode = #tpu.pipeline_mode<synchronous>, transform_indices = @transform_6, window_bounds = array<i64: 1, 8>}, {transform_indices = @transform_7, window_bounds = array<i64: 8, 8>}]} {
    %c0 = arith.constant 0 : index
    %c0_0 = arith.constant 0 : index
    %0 = vector.load %arg1[%c0, %c0_0] : memref<8x256xf32, #tpu.memory_space<vmem>>, vector<8x256xf32>
    %c0_1 = arith.constant 0 : index
    %c0_2 = arith.constant 0 : index
    %1 = vector.load %arg2[%c0_1, %c0_2] : memref<256x128xf32, #tpu.memory_space<vmem>>, vector<256x128xf32>
    %cst = arith.constant dense<0.000000e+00> : vector<8x128xf32>
    %2 = tpu.matmul %0, %1, %cst {dimension_numbers = #tpu.dot_dimension_numbers<[1], [0], [0], [1], [0, 0, 1, 1], [], []>} : vector<8x256xf32>, vector<256x128xf32>, vector<8x128xf32> -> vector<8x128xf32>
    %c0_3 = arith.constant 0 : index
    %c0_4 = arith.constant 0 : index
    %3 = vector.load %arg3[%c0_3, %c0_4] : memref<1x128xf32, #tpu.memory_space<vmem>>, vector<1x128xf32>
    %4 = vector.broadcast %3 : vector<1x128xf32> to vector<8x128xf32>
    %5 = arith.addf %2, %4 : vector<8x128xf32>
    %cst_5 = arith.constant 0.000000e+00 : f32
    %6 = vector.broadcast %cst_5 : f32 to vector<8x128xf32>
    %7 = arith.maximumf %5, %6 : vector<8x128xf32>
    %c0_6 = arith.constant 0 : index
    %c0_7 = arith.constant 0 : index
    %8 = vector.load %arg4[%c0_6, %c0_7] : memref<128x128xf32, #tpu.memory_space<vmem>>, vector<128x128xf32>
    %cst_8 = arith.constant dense<0.000000e+00> : vector<8x128xf32>
    %9 = tpu.matmul %7, %8, %cst_8 {dimension_numbers = #tpu.dot_dimension_numbers<[1], [0], [0], [1], [0, 0, 1, 1], [], []>} : vector<8x128xf32>, vector<128x128xf32>, vector<8x128xf32> -> vector<8x128xf32>
    %c0_9 = arith.constant 0 : index
    %c0_10 = arith.constant 0 : index
    %10 = vector.load %arg5[%c0_9, %c0_10] : memref<1x128xf32, #tpu.memory_space<vmem>>, vector<1x128xf32>
    %11 = vector.broadcast %10 : vector<1x128xf32> to vector<8x128xf32>
    %12 = arith.addf %9, %11 : vector<8x128xf32>
    %cst_11 = arith.constant 0.000000e+00 : f32
    %13 = vector.broadcast %cst_11 : f32 to vector<8x128xf32>
    %14 = arith.maximumf %12, %13 : vector<8x128xf32>
    %c0_12 = arith.constant 0 : index
    %c0_13 = arith.constant 0 : index
    %15 = vector.load %arg6[%c0_12, %c0_13] : memref<128x8xf32, #tpu.memory_space<vmem>>, vector<128x8xf32>
    %cst_14 = arith.constant dense<0.000000e+00> : vector<8x8xf32>
    %16 = tpu.matmul %14, %15, %cst_14 {dimension_numbers = #tpu.dot_dimension_numbers<[1], [0], [0], [1], [0, 0, 1, 1], [], []>} : vector<8x128xf32>, vector<128x8xf32>, vector<8x8xf32> -> vector<8x8xf32>
    %c0_15 = arith.constant 0 : index
    %c0_16 = arith.constant 0 : index
    %17 = vector.load %arg7[%c0_15, %c0_16] : memref<1x8xf32, #tpu.memory_space<vmem>>, vector<1x8xf32>
    %18 = vector.broadcast %17 : vector<1x8xf32> to vector<8x8xf32>
    %19 = arith.addf %16, %18 : vector<8x8xf32>
    %c0_17 = arith.constant 0 : index
    %c0_18 = arith.constant 0 : index
    %20 = vector.load %arg8[%c0_17, %c0_18] : memref<8x8xf32, #tpu.memory_space<vmem>>, vector<8x8xf32>
    tpu.vector_store %arg8[%c0_17, %c0_18], %19 {strides = array<i32>} : memref<8x8xf32, #tpu.memory_space<vmem>>, vector<8x8xf32>,
    return
  }
  func.func @transform_0(%arg0: i32) -> (i32, i32) {
    %c0_i32 = arith.constant 0 : i32
    %c0_i32_0 = arith.constant 0 : i32
    return %arg0, %c0_i32 : i32, i32
  }
  func.func @transform_1(%arg0: i32) -> (i32, i32) {
    %c0_i32 = arith.constant 0 : i32
    %c0_i32_0 = arith.constant 0 : i32
    %c0_i32_1 = arith.constant 0 : i32
    return %c0_i32, %c0_i32_0 : i32, i32
  }
  func.func @transform_2(%arg0: i32) -> (i32, i32) {
    %c0_i32 = arith.constant 0 : i32
    %c0_i32_0 = arith.constant 0 : i32
    %c0_i32_1 = arith.constant 0 : i32
    return %c0_i32, %c0_i32_0 : i32, i32
  }
  func.func @transform_3(%arg0: i32) -> (i32, i32) {
    %c0_i32 = arith.constant 0 : i32
    %c0_i32_0 = arith.constant 0 : i32
    %c0_i32_1 = arith.constant 0 : i32
    return %c0_i32, %c0_i32_0 : i32, i32
  }
  func.func @transform_4(%arg0: i32) -> (i32, i32) {
    %c0_i32 = arith.constant 0 : i32
    %c0_i32_0 = arith.constant 0 : i32
    %c0_i32_1 = arith.constant 0 : i32
    return %c0_i32, %c0_i32_0 : i32, i32
  }
  func.func @transform_5(%arg0: i32) -> (i32, i32) {
    %c0_i32 = arith.constant 0 : i32
    %c0_i32_0 = arith.constant 0 : i32
    %c0_i32_1 = arith.constant 0 : i32
    return %c0_i32, %c0_i32_0 : i32, i32
  }
  func.func @transform_6(%arg0: i32) -> (i32, i32) {
    %c0_i32 = arith.constant 0 : i32
    %c0_i32_0 = arith.constant 0 : i32
    %c0_i32_1 = arith.constant 0 : i32
    return %c0_i32, %c0_i32_0 : i32, i32
  }
  func.func @transform_7(%arg0: i32) -> (i32, i32) {
    %c0_i32 = arith.constant 0 : i32
    %c0_i32_0 = arith.constant 0 : i32
    return %arg0, %c0_i32 : i32, i32
  }
}

</mosaic_0001>

<bundles_post_ra>
// kernel: bp_forward.1
= control target key start
LH: loop header
LB: loop body
LE: loop exit
PB: predicated region body
PF: predicated region fallthrough
CT: control target
= control target key end

     0   :  { %12 = vsyncpa [#allocation3], 0  ;;  %s598_s24 = smov [#allocation2]   ;;  %s786_s0 = inlined_call_operand.vmem [shape: f32[8,256], index: 0, kind: input, shape index: {}]   ;;  %s787_s1 = inlined_call_operand.hbm [shape: f32[256,128], index: 1, kind: input, shape index: {}]   ;;  %s788_s2 = inlined_call_operand.vmem [shape: f32[1,128], index: 2, kind: input, shape index: {}]   ;;  %s789_s3 = inlined_call_operand.vmem [shape: f32[128,128], index: 3, kind: input, shape index: {}]   ;;  %s790_s4 = inlined_call_operand.vmem [shape: f32[1,128], index: 4, kind: input, shape index: {}]   ;;  %s791_s5 = inlined_call_operand.vmem [shape: f32[128,8], index: 5, kind: input, shape index: {}]   ;;  %s792_s6 = inlined_call_operand.vmem [shape: f32[1,8], index: 6, kind: input, shape index: {}]   ;;  %s793_s7 = inlined_call_operand.vmem [shape: f32[8,8], index: 7, kind: output, shape index: {}]  }
   0x1   :  { %s20_s25 = sshll.u32 %s598_s24, 4  ;;  %s574_s28 = scalar_lea.hbm %s787_s1, 4096  ;;  %s21_s25 = int_to_ptr.vmem [resolvable:$true] %s20_s25 }
   0x2   :  { %p575_p0 = scmp.ne.s32.totalorder %s787_s1, %s574_s28  ;;  %p578_p1 = scmp.lt.u32.totalorder %s574_s28, %s787_s1 }
   0x4   :  { %p580_p2 = pnand %p578_p1, %p575_p0 }
   0x6   :  { %583 = shalt.err (!%p580_p2)
}
   0x7   :  { %s584_s10 = scalar_lea.vmem %s21_s25, 4096  ;;  %p589_p4 = scmp.lt.s32.totalorder %s21_s25, %s21_s25 }
   0x8   :  { %p585_p3 = scmp.ne.s32.totalorder %s21_s25, %s584_s10  ;;  %p590_p5 = scmp.lt.s32.totalorder %s584_s10, %s584_s10 }
   0xa   :  { %p591_p6 = por %p590_p5, %p589_p4 }
   0xc   :  { %p592_p7 = pnand %p591_p6, %p585_p3 }
   0xe   :  { %595 = shalt.err (!%p592_p7)
}
   0xf   :  { %s599_s11 = smov 128   ;;  %s600_s12 = smov 8  }
  0x10   :  { %26 = dma.hbm_to_vmem [thread:$0]  %s787_s1, 4096, %s21_s25, [#allocation3], %s599_s11, %s599_s11, %s600_s12  }
  0x11   :  { %596 = dma.done.wait [#allocation3], 4096  }
  0x12   :  { %597 = vsyncadd [#allocation3], 4294963200  ;;  %v601_v0 = vmov 0.0|0.0   ;;  %v58_v1 = vld [vmem:[#allocation2 + $0x80] sm:$0xff]  ;;  %v59_v2 = vld [vmem:[#allocation2 + $0x88] sm:$0xff]  ;;  %vm602_vm0 = vmmov 0  }
  0x13   :  { %520 = vmatprep.subr.bf16.mxu1 %v601_v0  ;;  %v42_v3 = vld [vmem:[#allocation2] sm:$0xff]  ;;  %v488_v4 = vpack.c.bf16 %v59_v2, %v58_v1  ;;  %v43_v5 = vld [vmem:[#allocation2 + $0x8] sm:$0xff]  ;;  %v60_v6 = vld [vmem:[#allocation2 + $0x90] sm:$0xff]  ;;  %vm339_vm1 = vcmask 64512  }
  0x14   :  { %v61_v7 = vld [vmem:[#allocation2 + $0x98] sm:$0xff]  ;;  %v490_v8 = vpack.c.bf16 %v43_v5, %v42_v3  ;;  %v44_v10 = vld [vmem:[#allocation2 + $0x10] sm:$0xff]  ;;  %v62_v12 = vld [vmem:[#allocation2 + $0xa0] sm:$0xff] }
  0x15   :  { %v492_v9 = vpack.c.bf16 %v61_v7, %v60_v6  ;;  %v45_v11 = vld [vmem:[#allocation2 + $0x18] sm:$0xff]  ;;  %489 = vmatprep.subr.bf16.mxu0 %v488_v4  ;;  %v63_v13 = vld [vmem:[#allocation2 + $0xa8] sm:$0xff]  ;;  %v46_v16 = vld [vmem:[#allocation2 + $0x20] sm:$0xff] }
  0x16   :  { %491 = vmatpush3.bf16.msra.mxu0 %v490_v8  ;;  %v494_v14 = vpack.c.bf16 %v45_v11, %v44_v10  ;;  %v496_v15 = vpack.c.bf16 %v63_v13, %v62_v12  ;;  %v47_v17 = vld [vmem:[#allocation2 + $0x28] sm:$0xff]  ;;  %v64_v18 = vld [vmem:[#allocation2 + $0xb0] sm:$0xff]  ;;  %v65_v19 = vld [vmem:[#allocation2 + $0xb8] sm:$0xff]  ;;  %v603_v12 = vmov 0.0  }
  0x17   :  { %493 = vmatprep.subr.bf16.mxu0 %v492_v9  ;;  %v498_v20 = vpack.c.bf16 %v47_v17, %v46_v16  ;;  %v500_v21 = vpack.c.bf16 %v65_v19, %v64_v18  ;;  %v48_v22 = vld [vmem:[#allocation2 + $0x30] sm:$0xff]  ;;  %v49_v23 = vld [vmem:[#allocation2 + $0x38] sm:$0xff]  ;;  %v66_v24 = vld [vmem:[#allocation2 + $0xc0] sm:$0xff]  ;;  %450 = vmatprep.mubr.msk.f32.mxu1 %vm602_vm0, %v603_v12 }
  0x18   :  { %v67_v25 = vld [vmem:[#allocation2 + $0xc8] sm:$0xff]  ;;  %v41_v26 = vld [vmem:[%s786_s0 + $0x8] sm:$0xff]  ;;  %v152_v27 = vld [vmem:[%s789_s3] sm:$0xff]  ;;  %v502_v29 = vpack.c.bf16 %v49_v23, %v48_v22 }
  0x19   :  { %145 = vmatprep.mubr.f32.mxu0 %v41_v26  ;;  %v153_v28 = vld [vmem:[%s789_s3 + $0x8] sm:$0xff]  ;;  %v154_v31 = vld [vmem:[%s789_s3 + $0x10] sm:$0xff]  ;;  %v155_v32 = vld [vmem:[%s789_s3 + $0x18] sm:$0xff]  ;;  %v504_v33 = vpack.c.bf16 %v67_v25, %v66_v24 }
  0x1a   :  { %495 = vmatpush3.bf16.msra.mxu0 %v494_v14  ;;  %v521_v30 = vpack.c.bf16 %v153_v28, %v152_v27  ;;  %v50_v34 = vld [vmem:[#allocation2 + $0x40] sm:$0xff]  ;;  %v51_v35 = vld [vmem:[#allocation2 + $0x48] sm:$0xff]  ;;  %v68_v36 = vld [vmem:[#allocation2 + $0xd0] sm:$0xff]  ;;  %v524_v38 = vpack.c.bf16 %v155_v32, %v154_v31 }
  0x1b   :  { %497 = vmatprep.subr.bf16.mxu0 %v496_v15  ;;  %v69_v37 = vld [vmem:[#allocation2 + $0xd8] sm:$0xff]  ;;  %v157_v40 = vld [vmem:[%s789_s3 + $0x28] sm:$0xff]  ;;  %v506_v41 = vpack.c.bf16 %v51_v35, %v50_v34  ;;  %v52_v43 = vld [vmem:[#allocation2 + $0x50] sm:$0xff] }
  0x1c   :  { %522 = vmatpush3.bf16.msra.mxu1 %v521_v30  ;;  %v156_v39 = vld [vmem:[%s789_s3 + $0x20] sm:$0xff]  ;;  %v508_v42 = vpack.c.bf16 %v69_v37, %v68_v36  ;;  %v70_v45 = vld [vmem:[#allocation2 + $0xe0] sm:$0xff]  ;;  %v71_v46 = vld [vmem:[#allocation2 + $0xe8] sm:$0xff] }
  0x1d   :  { %523 = vmatprep.subr.bf16.mxu1 %v601_v0  ;;  %v53_v44 = vld [vmem:[#allocation2 + $0x58] sm:$0xff]  ;;  %v527_v47 = vpack.c.bf16 %v157_v40, %v156_v39  ;;  %v158_v48 = vld [vmem:[%s789_s3 + $0x30] sm:$0xff]  ;;  %v159_v49 = vld [vmem:[%s789_s3 + $0x38] sm:$0xff]  ;;  %v512_v51 = vpack.c.bf16 %v71_v46, %v70_v45 }
  0x1e   :  { %499 = vmatpush3.bf16.msra.mxu0 %v498_v20  ;;  %v510_v50 = vpack.c.bf16 %v53_v44, %v52_v43  ;;  %v54_v52 = vld [vmem:[#allocation2 + $0x60] sm:$0xff]  ;;  %v55_v53 = vld [vmem:[#allocation2 + $0x68] sm:$0xff]  ;;  %v72_v54 = vld [vmem:[#allocation2 + $0xf0] sm:$0xff]  ;;  %v530_v56 = vpack.c.bf16 %v159_v49, %v158_v48 }
  0x1f   :  { %501 = vmatprep.subr.bf16.mxu0 %v500_v21  ;;  %v73_v55 = vld [vmem:[#allocation2 + $0xf8] sm:$0xff]  ;;  %v161_v58 = vld [vmem:[%s789_s3 + $0x48] sm:$0xff]  ;;  %v514_v59 = vpack.c.bf16 %v55_v53, %v54_v52  ;;  %v56_v61 = vld [vmem:[#allocation2 + $0x70] sm:$0xff] }
  0x20   :  { %525 = vmatpush3.bf16.msra.mxu1 %v524_v38  ;;  %v160_v57 = vld [vmem:[%s789_s3 + $0x40] sm:$0xff]  ;;  %v516_v60 = vpack.c.bf16 %v73_v55, %v72_v54  ;;  %v162_v1 = vld [vmem:[%s789_s3 + $0x50] sm:$0xff]  ;;  %v163_v2 = vld [vmem:[%s789_s3 + $0x58] sm:$0xff] }
  0x21   :  { %526 = vmatprep.subr.bf16.mxu1 %v601_v0  ;;  %v57_v62 = vld [vmem:[#allocation2 + $0x78] sm:$0xff]  ;;  %v533_v63 = vpack.c.bf16 %v161_v58, %v160_v57  ;;  %v536_v4 = vpack.c.bf16 %v163_v2, %v162_v1  ;;  %v165_v7 = vld [vmem:[%s789_s3 + $0x68] sm:$0xff]  ;;  %v166_v9 = vld [vmem:[%s789_s3 + $0x70] sm:$0xff] }
  0x22   :  { %503 = vmatpush3.bf16.msra.mxu0 %v502_v29  ;;  %v518_v3 = vpack.c.bf16 %v57_v62, %v56_v61  ;;  %v40_v5 = vld [vmem:[%s786_s0] sm:$0xff]  ;;  %v167_v10 = vld [vmem:[%s789_s3 + $0x78] sm:$0xff]  ;;  %v247_v14 = vld [vmem:[%s791_s5 + $0x8] sm:$0xff] }
  0x23   :  { %505 = vmatprep.subr.bf16.mxu0 %v504_v33  ;;  %v164_v6 = vld [vmem:[%s789_s3 + $0x60] sm:$0xff]  ;;  %v542_v11 = vpack.c.bf16 %v167_v10, %v166_v9  ;;  %v248_v15 = vld [vmem:[%s791_s5 + $0x10] sm:$0xff]  ;;  %v249_v17 = vld [vmem:[%s791_s5 + $0x18] sm:$0xff] }
  0x24   :  { %528 = vmatpush3.bf16.msra.mxu1 %v527_v47  ;;  %v539_v8 = vpack.c.bf16 %v165_v7, %v164_v6  ;;  %v246_v13 = vld [vmem:[%s791_s5] sm:$0xff]  ;;  %v548_v18 = vpack.c.bf16 %v249_v17, %v248_v15  ;;  %v251_v20 = vld [vmem:[%s791_s5 + $0x28] sm:$0xff]  ;;  %v252_v22 = vld [vmem:[%s791_s5 + $0x30] sm:$0xff] }
  0x25   :  { %529 = vmatprep.subr.bf16.mxu1 %v601_v0  ;;  %v545_v16 = vpack.c.bf16 %v247_v14, %v246_v13  ;;  %v250_v19 = vld [vmem:[%s791_s5 + $0x20] sm:$0xff]  ;;  %v253_v23 = vld [vmem:[%s791_s5 + $0x38] sm:$0xff]  ;;  %v255_v26 = vld [vmem:[%s791_s5 + $0x48] sm:$0xff] }
  0x26   :  { %507 = vmatpush3.bf16.msra.mxu0 %v506_v41  ;;  %v551_v21 = vpack.c.bf16 %v251_v20, %v250_v19  ;;  %v554_v24 = vpack.c.bf16 %v253_v23, %v252_v22  ;;  %v254_v25 = vld [vmem:[%s791_s5 + $0x40] sm:$0xff]  ;;  %v256_v28 = vld [vmem:[%s791_s5 + $0x50] sm:$0xff]  ;;  %v257_v29 = vld [vmem:[%s791_s5 + $0x58] sm:$0xff] }
  0x27   :  { %509 = vmatprep.subr.bf16.mxu0 %v508_v42  ;;  %v557_v27 = vpack.c.bf16 %v255_v26, %v254_v25  ;;  %v560_v30 = vpack.c.bf16 %v257_v29, %v256_v28  ;;  %v258_v31 = vld [vmem:[%s791_s5 + $0x60] sm:$0xff]  ;;  %v259_v32 = vld [vmem:[%s791_s5 + $0x68] sm:$0xff]  ;;  %v260_v40 = vld [vmem:[%s791_s5 + $0x70] sm:$0xff] }
  0x28   :  { %531 = vmatpush3.bf16.msra.mxu1 %v530_v56  ;;  %v563_v33 = vpack.c.bf16 %v259_v32, %v258_v31  ;;  %v346_v35 = vld [vmem:[%s788_s2] ss:$0 sm:$0xff]  ;;  %v261_v41 = vld [vmem:[%s791_s5 + $0x78] sm:$0xff] }
  0x29   :  { %532 = vmatprep.subr.bf16.mxu1 %v601_v0  ;;  %v566_v42 = vpack.c.bf16 %v261_v41, %v260_v40  ;;  %v348_v47 = vld [vmem:[%s792_s6] ss:$0 sm:$0xff] }
  0x2a   :  { %511 = vmatpush3.bf16.msra.mxu0 %v510_v50 }
  0x2b   :  { %513 = vmatprep.subr.bf16.mxu0 %v512_v51 }
  0x2c   :  { %534 = vmatpush3.bf16.msra.mxu1 %v533_v63 }
  0x2d   :  { %535 = vmatprep.subr.bf16.mxu1 %v601_v0 }
  0x2e   :  { %515 = vmatpush3.bf16.msra.mxu0 %v514_v59 }
  0x2f   :  { %517 = vmatprep.subr.bf16.mxu0 %v516_v60 }
  0x30   :  { %537 = vmatpush3.bf16.msra.mxu1 %v536_v4 }
  0x31   :  { %538 = vmatprep.subr.bf16.mxu1 %v601_v0 }
  0x32   :  { %519 = vmatpush3.bf16.msra.mxu0 %v518_v3 }
  0x33   :  { %544 = vmatprep.subr.bf16.mxu0 %v601_v0 }
  0x34   :  { %540 = vmatpush3.bf16.msra.mxu1 %v539_v8 }
  0x35   :  { %146 = vmatmul.mubr.f32.vlgmr.msra.gmra.mrb[0].mxu0 %v40_v5  ;;  %541 = vmatprep.subr.bf16.mxu1 %v601_v0 }
  0x36   :  { %485 = vmatprep.mubr.msk.f32.mxu0 %vm602_vm0, %v603_v12  ;;  %546 = vmatpush3.bf16.msra.mxu0 %v545_v16 }
  0x37   :  { %547 = vmatprep.subr.bf16.mxu0 %v601_v0 }
  0x38   :  { %543 = vmatpush3.bf16.msra.mxu1 %v542_v11 }
  0x3a   :  { %549 = vmatpush3.bf16.msra.mxu0 %v548_v18 }
  0x3b   :  { %550 = vmatprep.subr.bf16.mxu0 %v601_v0 }
  0x3e   :  { %552 = vmatpush3.bf16.msra.mxu0 %v551_v21 }
  0x3f   :  { %553 = vmatprep.subr.bf16.mxu0 %v601_v0 }
  0x42   :  { %555 = vmatpush3.bf16.msra.mxu0 %v554_v24 }
  0x43   :  { %556 = vmatprep.subr.bf16.mxu0 %v601_v0 }
  0x46   :  { %558 = vmatpush3.bf16.msra.mxu0 %v557_v27 }
  0x47   :  { %559 = vmatprep.subr.bf16.mxu0 %v601_v0 }
  0x4a   :  { %561 = vmatpush3.bf16.msra.mxu0 %v560_v30 }
  0x4b   :  { %562 = vmatprep.subr.bf16.mxu0 %v601_v0 }
  0x4e   :  { %564 = vmatpush3.bf16.msra.mxu0 %v563_v33 }
  0x4f   :  { %565 = vmatprep.subr.bf16.mxu0 %v601_v0  ;;  %v347_v0 = vld [vmem:[%s790_s4] ss:$0 sm:$0xff] }
  0x52   :  { %567 = vmatpush3.bf16.msra.mxu0 %v566_v42 }
 0x108   :  { %v381_v34 = vpop.f32.mrb[0].mxu0 }
 0x109   :  { %v382_v36 = vpop.f32.mrb[1].mxu0 }
 0x10a   :  { %v383_v37 = vadd.f32 %v382_v36, %v381_v34 }
 0x10c   :  { %v148_v38 = vadd.f32 %v383_v37, %v346_v35 }
 0x10e   :  { %v151_v39 = vmax.f32 %v148_v38, 0.0 }
 0x110   :  { %451 = vmatmul.mubr.f32.vlgmr.msra.gmra.mrb[0].mxu1 %v151_v39 }
 0x1e3   :  { %v241_v43 = vpop.f32.mrb[0].mxu1 }
 0x1e4   :  { %v242_v44 = vadd.f32 %v347_v0, %v241_v43  ;;  %v452_v45 = vpop.f32.mrb[1].mxu1 }
 0x1e6   :  { %v245_v46 = vmax.f32 %v242_v44, 0.0 }
 0x1e8   :  { %486 = vmatmul.mubr.f32.vlgmr.msra.gmra.mrb[2].mxu0 %v245_v46 }
 0x2bb   :  { %v335_v48 = vpop.f32.mrb[2].mxu0 }
 0x2bc   :  { %v336_v49 = vadd.f32 %v348_v47, %v335_v48  ;;  %v487_v50 = vpop.f32.mrb[3].mxu0 }
 0x2be   :  { %340 = vst.msk [vmem:[%s793_s7] sm:$0xff] %vm339_vm1, %v336_v49 }
 0x2bf   :  { %345 = vsyncpa [#allocation3], 1 }

</bundles_post_ra>
